<compile_context>
chip_gen: v7x
topology: tpu7x:2x2x1
jax: 0.10.0
libtpu: 0.0.40
codegen_flags: <defaults>
</compile_context>

<pallas_src>
import jax
import jax.numpy as jnp
from jax.experimental import pallas as pl
from jax.experimental.pallas import tpu as pltpu

W_NORMAL = 1.0
W_AUX = 0.5


def _round_up(x, m):
    return (x + m - 1) // m * m


def _vmem_capacity_bytes():
    try:
        return int(pltpu.get_tpu_info().vmem_capacity_bytes)
    except Exception:
        return 64 * 1024 * 1024  # conservative fallback (v7x per-TC)


def _default_batch_blocks(batch):
    # v7x has 2 TensorCores per chip, each with its own HBM path: split the
    # HBM-bound stream across them via a "parallel" batch grid axis.
    try:
        kind = jax.devices()[0].device_kind.lower()
    except Exception:
        return 1
    if "v7" in kind and batch >= 2 and batch % 2 == 0:
        return 2
    return 1


def _make_kernel(true_c, inv_n):
    """Kernel closure over the true class count and global 1/(B*C)."""

    def kernel(logit_ref, target_ref, frame_ref, out_ref, max_acc):
        t = pl.program_id(1)

        # --- init the resident running-max accumulator (per batch block) -----
        @pl.when(t == 0)
        def _():
            max_acc[...] = jnp.full(max_acc.shape, -jnp.inf, dtype=max_acc.dtype)

        # --- streaming body: fold the time tile with pure-VPU maxima ---------
        # (cross-sublane reduce is deferred to the finalize step)
        tile = frame_ref[...]                              # (B_blk, t_tile, C_pad), native dtype
        b_blk, t_tile, c_pad = tile.shape
        part = jnp.max(tile.reshape(b_blk, t_tile // 8, 8, c_pad), axis=1)
        max_acc[...] = jnp.maximum(max_acc[...], part)     # (B_blk, 8, C_pad)

        # --- finalize: BCE terms + masked partial sums, once ------------------
        @pl.when(t == pl.num_programs(1) - 1)
        def _():
            x = logit_ref[...].astype(jnp.float32)         # (B_blk, C_pad)
            y = target_ref[...].astype(jnp.float32)        # (B_blk, C_pad)
            p = jnp.max(max_acc[...], axis=1).astype(jnp.float32)  # (B_blk, C_pad)
            b, c_pad2 = x.shape

            # Mask padded class lanes; denominators use the true global B*C.
            col = jax.lax.broadcasted_iota(jnp.int32, (b, c_pad2), 1)
            valid = (col < true_c).astype(jnp.float32)

            # BCEWithLogitsLoss (numerically stable form).
            normal_elem = (jnp.maximum(x, 0.0) - x * y
                           + jnp.log1p(jnp.exp(-jnp.abs(x))))

            # BCELoss on the clipwise max; PyTorch clamps log terms at -100.
            log_p = jnp.maximum(jnp.log(p), -100.0)
            log_1mp = jnp.maximum(jnp.log(1.0 - p), -100.0)
            aux_elem = -(y * log_p + (1.0 - y) * log_1mp)

            normal_sum = jnp.sum(normal_elem * valid)
            aux_sum = jnp.sum(aux_elem * valid)
            partial = (W_NORMAL * normal_sum + W_AUX * aux_sum) * inv_n
            # Lane-dense 128-wide output row for this batch block (scalar replicated).
            out_ref[...] = jnp.zeros(out_ref.shape, jnp.float32) + partial

    return kernel


def improved_panns_loss(logit, framewise_output, target, *,
                        vmem_budget_bytes=None,
                        num_batch_blocks=None,
                        stream_buffer_count=2,
                        downcast_framewise_to_bf16=False):
    """logit: (B, C); framewise_output: (B, T, C) probabilities; target: (B, C)."""
    B, C = logit.shape
    Bf, T, Cf = framewise_output.shape
    assert (Bf, Cf) == (B, C), "framewise_output must be (B, T, C)"

    # Matches PyTorch's target.float().
    target = target.astype(jnp.float32)

    # Opt-in: halve streamed HBM bytes (small shift in aux-loss numerics).
    if downcast_framewise_to_bf16 and framewise_output.dtype == jnp.float32:
        framewise_output = framewise_output.astype(jnp.bfloat16)

    # Batch-block split (v7x dual-TensorCore); only when it divides B evenly.
    n_b = num_batch_blocks if num_batch_blocks is not None else _default_batch_blocks(B)
    if n_b < 1 or B % n_b != 0:
        n_b = 1
    B_blk = B // n_b

    # Lane-dense class axis.
    C_pad = max(128, _round_up(C, 128))
    frame_bytes = jnp.dtype(framewise_output.dtype).itemsize
    in_bytes = jnp.dtype(logit.dtype).itemsize

    # Generation-aware VMEM budget/caps.
    vmem_cap = _vmem_capacity_bytes()
    vmem_limit_cap = max(16 * 1024 * 1024, (vmem_cap * 3) // 4)
    if vmem_budget_bytes is None:
        # Total stream budget (all buffers): generous on 128 MiB parts, tight on 64 MiB.
        vmem_budget_bytes = (48 * 1024 * 1024 if vmem_cap >= 96 * 1024 * 1024
                             else 16 * 1024 * 1024)
    n_buf = max(2, stream_buffer_count)
    per_buffer_bytes = max(1, vmem_budget_bytes // n_buf)

    # Byte-targeted time tile (multiple of 8 sublanes), capped only by T.
    rows = per_buffer_bytes // (B_blk * C_pad * frame_bytes)
    t_tile = max(8, (rows // 8) * 8)
    t_tile = min(t_tile, _round_up(T, 8))
    # Re-balance tiles so zero-padding of the time axis stays minimal.
    n_t = -(-T // t_tile)
    t_tile = _round_up(-(-T // n_t), 8)
    T_pad = _round_up(T, t_tile)

    # Wrapper-side padding. Zeros are safe: framewise is a probability map, so
    # padded time rows never win the max; padded class lanes are masked in-kernel.
    if C_pad != C:
        logit = jnp.pad(logit, ((0, 0), (0, C_pad - C)))
        target = jnp.pad(target, ((0, 0), (0, C_pad - C)))
    if C_pad != C or T_pad != T:
        framewise_output = jnp.pad(
            framewise_output, ((0, 0), (0, T_pad - T), (0, C_pad - C)))

    grid = (n_b, T_pad // t_tile)

    stream_bytes = n_buf * B_blk * t_tile * C_pad * frame_bytes
    resident_bytes = (2 * B_blk * C_pad * (in_bytes + 4)      # logit/target (double-buffered)
                      + B_blk * 8 * C_pad * frame_bytes)      # running-max scratch
    vmem_limit = int(stream_bytes + resident_bytes) + (4 << 20)
    vmem_limit = min(max(vmem_limit, 16 * 1024 * 1024), vmem_limit_cap)

    cost = pl.CostEstimate(
        flops=int(B * T_pad * C_pad + 12 * B * C_pad),
        transcendentals=int(3 * B * C_pad),
        bytes_accessed=int(B * T_pad * C_pad * frame_bytes
                           + B * C_pad * (in_bytes + 4) + n_b * 128 * 4),
    )

    frame_spec_kwargs = {}
    if stream_buffer_count != 2:
        frame_spec_kwargs["pipeline_mode"] = pl.Buffered(stream_buffer_count)

    out = pl.pallas_call(
        _make_kernel(C, 1.0 / float(B * C)),
        out_shape=jax.ShapeDtypeStruct((1, n_b * 128), jnp.float32),
        grid=grid,
        in_specs=[
            pl.BlockSpec((B_blk, C_pad), lambda b, t: (b, 0)),              # resident logit
            pl.BlockSpec((B_blk, C_pad), lambda b, t: (b, 0)),              # resident target
            pl.BlockSpec((B_blk, t_tile, C_pad), lambda b, t: (b, t, 0),    # streamed framewise
                         **frame_spec_kwargs),
        ],
        out_specs=pl.BlockSpec((1, 128), lambda b, t: (0, b)),
        scratch_shapes=[pltpu.VMEM((B_blk, 8, C_pad), framewise_output.dtype)],
        compiler_params=pltpu.CompilerParams(
            dimension_semantics=("parallel", "arbitrary"),
            vmem_limit_bytes=vmem_limit,
        ),
        cost_estimate=cost,
    )(logit, target, framewise_output)

    # One lane-dense 128-wide row per batch block (scalar replicated): pick lane 0.
    return jnp.sum(out[0, ::128])


def _reference_loss(logit, framewise_output, target):
    x = logit.astype(jnp.float32)
    y = target.astype(jnp.float32)
    p = jnp.max(framewise_output.astype(jnp.float32), axis=1)
    normal = jnp.mean(jnp.maximum(x, 0.0) - x * y + jnp.log1p(jnp.exp(-jnp.abs(x))))
    aux = jnp.mean(-(y * jnp.maximum(jnp.log(p), -100.0)
                     + (1.0 - y) * jnp.maximum(jnp.log(1.0 - p), -100.0)))
    return W_NORMAL * normal + W_AUX * aux


if __name__ == "__main__":
    B, T, C = 2, 8, 32
    key = jax.random.PRNGKey(0)
    k1, k2, k3 = jax.random.split(key, 3)

    logit = jax.random.normal(k1, (B, C), dtype=jnp.float32)
    # framewise_output is a probability map (sigmoid output in PANNs)
    framewise_output = jax.nn.sigmoid(jax.random.normal(k2, (B, T, C), dtype=jnp.float32))
    # binary multi-label targets
    target = (jax.random.uniform(k3, (B, C)) > 0.5).astype(jnp.float32)

    loss = improved_panns_loss(logit, framewise_output, target)
    loss = jax.block_until_ready(loss)

    ref = _reference_loss(logit, framewise_output, target)
    assert jnp.allclose(loss, ref, rtol=1e-5, atol=1e-5), (loss, ref)

    # TODO(synk): optionally exercise num_batch_blocks=2 / stream_buffer_count=3
    # sweeps on multi-core (v7x) hardware; defaults are single-block / double-buffered.
    print("KERNEL_OK")
</pallas_src>

<mosaic_0001>
module attributes {stable_mosaic.version = 11 : i64} {
  func.func @kernel(%arg0: i32, %arg1: i32, %arg2: memref<2x128xf32, #tpu.memory_space<vmem>>, %arg3: memref<2x128xf32, #tpu.memory_space<vmem>>, %arg4: memref<2x8x128xf32, #tpu.memory_space<vmem>>, %arg5: memref<1x128xf32, #tpu.memory_space<vmem>>, %arg6: memref<2x8x128xf32, #tpu.memory_space<vmem>>) attributes {dimension_semantics = [#tpu.dimension_semantics<parallel>, #tpu.dimension_semantics<arbitrary>], iteration_bounds = array<i64: 1, 1>, scalar_prefetch = 0 : i64, scratch_operands = 1 : i64, tpu.core_type = #tpu.core_type<tc>, window_params = [{transform_indices = @transform_0, window_bounds = array<i64: 2, 128>}, {transform_indices = @transform_1, window_bounds = array<i64: 2, 128>}, {transform_indices = @transform_2, window_bounds = array<i64: 2, 8, 128>}, {transform_indices = @transform_3, window_bounds = array<i64: 1, 128>}]} {
    %c0_i32 = arith.constant 0 : i32
    %0 = arith.cmpi eq, %arg1, %c0_i32 : i32
    %1 = arith.extui %0 : i1 to i32
    %c0_i32_0 = arith.constant 0 : i32
    %2 = arith.cmpi ne, %1, %c0_i32_0 : i32
    scf.if %2 {
      %cst_11 = arith.constant 0xFF800000 : f32
      %12 = vector.broadcast %cst_11 : f32 to vector<2x8x128xf32>
      %c0_12 = arith.constant 0 : index
      %c0_13 = arith.constant 0 : index
      %c0_14 = arith.constant 0 : index
      %13 = vector.load %arg6[%c0_12, %c0_13, %c0_14] : memref<2x8x128xf32, #tpu.memory_space<vmem>>, vector<2x8x128xf32>
      tpu.vector_store %arg6[%c0_12, %c0_13, %c0_14], %12 {strides = array<i32>} : memref<2x8x128xf32, #tpu.memory_space<vmem>>, vector<2x8x128xf32>,
    } else {
    }
    %c0 = arith.constant 0 : index
    %c0_1 = arith.constant 0 : index
    %c0_2 = arith.constant 0 : index
    %3 = vector.load %arg4[%c0, %c0_1, %c0_2] : memref<2x8x128xf32, #tpu.memory_space<vmem>>, vector<2x8x128xf32>
    %4 = vector.shape_cast %3 : vector<2x8x128xf32> to vector<2x1x8x128xf32>
    %cst = arith.constant dense<0xFF800000> : vector<2x8x128xf32>
    %5 = vector.multi_reduction <maximumf>, %4, %cst [1] : vector<2x1x8x128xf32> to vector<2x8x128xf32>
    %c0_3 = arith.constant 0 : index
    %c0_4 = arith.constant 0 : index
    %c0_5 = arith.constant 0 : index
    %6 = vector.load %arg6[%c0_3, %c0_4, %c0_5] : memref<2x8x128xf32, #tpu.memory_space<vmem>>, vector<2x8x128xf32>
    %7 = arith.maximumf %6, %5 : vector<2x8x128xf32>
    %c0_6 = arith.constant 0 : index
    %c0_7 = arith.constant 0 : index
    %c0_8 = arith.constant 0 : index
    %8 = vector.load %arg6[%c0_6, %c0_7, %c0_8] : memref<2x8x128xf32, #tpu.memory_space<vmem>>, vector<2x8x128xf32>
    tpu.vector_store %arg6[%c0_6, %c0_7, %c0_8], %7 {strides = array<i32>} : memref<2x8x128xf32, #tpu.memory_space<vmem>>, vector<2x8x128xf32>,
    %c0_i32_9 = arith.constant 0 : i32
    %9 = arith.cmpi eq, %arg1, %c0_i32_9 : i32
    %10 = arith.extui %9 : i1 to i32
    %c0_i32_10 = arith.constant 0 : i32
    %11 = arith.cmpi ne, %10, %c0_i32_10 : i32
    scf.if %11 {
      %c0_11 = arith.constant 0 : index
      %c0_12 = arith.constant 0 : index
      %12 = vector.load %arg2[%c0_11, %c0_12] : memref<2x128xf32, #tpu.memory_space<vmem>>, vector<2x128xf32>
      %c0_13 = arith.constant 0 : index
      %c0_14 = arith.constant 0 : index
      %13 = vector.load %arg3[%c0_13, %c0_14] : memref<2x128xf32, #tpu.memory_space<vmem>>, vector<2x128xf32>
      %c0_15 = arith.constant 0 : index
      %c0_16 = arith.constant 0 : index
      %c0_17 = arith.constant 0 : index
      %14 = vector.load %arg6[%c0_15, %c0_16, %c0_17] : memref<2x8x128xf32, #tpu.memory_space<vmem>>, vector<2x8x128xf32>
      %cst_18 = arith.constant dense<0xFF800000> : vector<2x128xf32>
      %15 = vector.multi_reduction <maximumf>, %14, %cst_18 [1] : vector<2x8x128xf32> to vector<2x128xf32>
      %16 = tpu.iota {dimensions = array<i32: 1>} : vector<2x128xi32>
      %c32_i32 = arith.constant 32 : i32
      %17 = vector.broadcast %c32_i32 : i32 to vector<2x128xi32>
      %18 = arith.cmpi slt, %16, %17 : vector<2x128xi32>
      %19 = arith.extui %18 : vector<2x128xi1> to vector<2x128xi32>
      %20 = arith.sitofp %19 : vector<2x128xi32> to vector<2x128xf32>
      %cst_19 = arith.constant 0.000000e+00 : f32
      %21 = vector.broadcast %cst_19 : f32 to vector<2x128xf32>
      %22 = arith.maximumf %12, %21 : vector<2x128xf32>
      %23 = arith.mulf %12, %13 : vector<2x128xf32>
      %24 = arith.subf %22, %23 : vector<2x128xf32>
      %25 = math.absf %12 : vector<2x128xf32>
      %cst_20 = arith.constant 0.000000e+00 : f32
      %26 = vector.broadcast %cst_20 : f32 to vector<2x128xf32>
      %27 = arith.subf %26, %25 : vector<2x128xf32>
      %28 = math.exp %27 : vector<2x128xf32>
      %29 = math.log1p %28 : vector<2x128xf32>
      %30 = arith.addf %24, %29 : vector<2x128xf32>
      %31 = math.log %15 : vector<2x128xf32>
      %cst_21 = arith.constant -1.000000e+02 : f32
      %32 = vector.broadcast %cst_21 : f32 to vector<2x128xf32>
      %33 = arith.maximumf %31, %32 : vector<2x128xf32>
      %cst_22 = arith.constant 1.000000e+00 : f32
      %34 = vector.broadcast %cst_22 : f32 to vector<2x128xf32>
      %35 = arith.subf %34, %15 : vector<2x128xf32>
      %36 = math.log %35 : vector<2x128xf32>
      %cst_23 = arith.constant -1.000000e+02 : f32
      %37 = vector.broadcast %cst_23 : f32 to vector<2x128xf32>
      %38 = arith.maximumf %36, %37 : vector<2x128xf32>
      %39 = arith.mulf %13, %33 : vector<2x128xf32>
      %cst_24 = arith.constant 1.000000e+00 : f32
      %40 = vector.broadcast %cst_24 : f32 to vector<2x128xf32>
      %41 = arith.subf %40, %13 : vector<2x128xf32>
      %42 = arith.mulf %41, %38 : vector<2x128xf32>
      %43 = arith.addf %39, %42 : vector<2x128xf32>
      %cst_25 = arith.constant 0.000000e+00 : f32
      %44 = vector.broadcast %cst_25 : f32 to vector<2x128xf32>
      %45 = arith.subf %44, %43 : vector<2x128xf32>
      %46 = arith.mulf %30, %20 : vector<2x128xf32>
      %47 = vector.shape_cast %46 : vector<2x128xf32> to vector<1x2x128xf32>
      %cst_26 = arith.constant dense<0.000000e+00> : vector<1xf32>
      %48 = vector.multi_reduction <add>, %47, %cst_26 [1, 2] : vector<1x2x128xf32> to vector<1xf32>
      %49 = vector.shape_cast %48 : vector<1xf32> to vector<1x1x1xf32>
      %50 = vector.extract %49[0, 0, 0] : f32 from vector<1x1x1xf32>
      %51 = arith.mulf %45, %20 : vector<2x128xf32>
      %52 = vector.shape_cast %51 : vector<2x128xf32> to vector<1x2x128xf32>
      %cst_27 = arith.constant dense<0.000000e+00> : vector<1xf32>
      %53 = vector.multi_reduction <add>, %52, %cst_27 [1, 2] : vector<1x2x128xf32> to vector<1xf32>
      %54 = vector.shape_cast %53 : vector<1xf32> to vector<1x1x1xf32>
      %55 = vector.extract %54[0, 0, 0] : f32 from vector<1x1x1xf32>
      %cst_28 = arith.constant 1.000000e+00 : f32
      %56 = arith.mulf %cst_28, %50 : f32
      %cst_29 = arith.constant 5.000000e-01 : f32
      %57 = arith.mulf %cst_29, %55 : f32
      %58 = arith.addf %56, %57 : f32
      %cst_30 = arith.constant 1.562500e-02 : f32
      %59 = arith.mulf %58, %cst_30 : f32
      %cst_31 = arith.constant 0.000000e+00 : f32
      %60 = vector.broadcast %cst_31 : f32 to vector<1x128xf32>
      %61 = vector.broadcast %59 : f32 to vector<1x128xf32>
      %62 = arith.addf %60, %61 : vector<1x128xf32>
      %c0_32 = arith.constant 0 : index
      %c0_33 = arith.constant 0 : index
      %63 = vector.load %arg5[%c0_32, %c0_33] : memref<1x128xf32, #tpu.memory_space<vmem>>, vector<1x128xf32>
      tpu.vector_store %arg5[%c0_32, %c0_33], %62 {strides = array<i32>} : memref<1x128xf32, #tpu.memory_space<vmem>>, vector<1x128xf32>,
    } else {
    }
    return
  }
  func.func @transform_0(%arg0: i32, %arg1: i32) -> (i32, i32) {
    %c0_i32 = arith.constant 0 : i32
    %c0_i32_0 = arith.constant 0 : i32
    return %arg0, %c0_i32 : i32, i32
  }
  func.func @transform_1(%arg0: i32, %arg1: i32) -> (i32, i32) {
    %c0_i32 = arith.constant 0 : i32
    %c0_i32_0 = arith.constant 0 : i32
    return %arg0, %c0_i32 : i32, i32
  }
  func.func @transform_2(%arg0: i32, %arg1: i32) -> (i32, i32, i32) {
    %c0_i32 = arith.constant 0 : i32
    %c0_i32_0 = arith.constant 0 : i32
    return %arg0, %arg1, %c0_i32 : i32, i32, i32
  }
  func.func @transform_3(%arg0: i32, %arg1: i32) -> (i32, i32) {
    %c0_i32 = arith.constant 0 : i32
    %c0_i32_0 = arith.constant 0 : i32
    return %c0_i32, %arg0 : i32, i32
  }
}

</mosaic_0001>

<bundles_post_ra>
// kernel: tpu_custom_call.1
= control target key start
LH: loop header
LB: loop body
LE: loop exit
PB: predicated region body
PF: predicated region fallthrough
CT: control target
= control target key end

     0   :  { %8 = vsyncpa [#allocation4], 0  ;;  %s338_s0 = inlined_call_operand.hbm [shape: f32[2,128], index: 0, kind: input, shape index: {}]   ;;  %s339_s1 = inlined_call_operand.vmem [shape: f32[2,128], index: 1, kind: input, shape index: {}]   ;;  %s340_s2 = inlined_call_operand.hbm [shape: f32[2,8,128], index: 2, kind: input, shape index: {}]   ;;  %s341_s3 = inlined_call_operand.hbm [shape: f32[1,128], index: 3, kind: output, shape index: {}]  }
   0x1   :  { %9 = vsyncpa [#allocation7], 0 }
   0x2   :  { %10 = vsyncpa [#allocation5], 0  ;;  %s264_s12 = smov [#allocation3]   ;;  %s265_s14 = smov [#allocation6]  }
   0x3   :  { %s17_s13 = sshll.u32 %s264_s12, 4  ;;  %s28_s15 = sshll.u32 %s265_s14, 4  ;;  %s18_s13 = int_to_ptr.vmem [resolvable:$true] %s17_s13  ;;  %s290_s15 = int_to_ptr.vmem [resolvable:$true] %s28_s15 }
   0x4   :  { %s192_s18 = scalar_lea.hbm %s338_s0, 32 }
   0x5   :  { %p193_p0 = scmp.ne.s32.totalorder %s338_s0, %s192_s18  ;;  %p196_p1 = scmp.lt.u32.totalorder %s192_s18, %s338_s0 }
   0x7   :  { %p198_p2 = pnand %p196_p1, %p193_p0 }
   0x9   :  { %201 = shalt.err (!%p198_p2)
}
   0xa   :  { %s202_s23 = scalar_lea.vmem %s18_s13, 32  ;;  %p207_p4 = scmp.lt.s32.totalorder %s18_s13, %s18_s13 }
   0xb   :  { %p203_p3 = scmp.ne.s32.totalorder %s18_s13, %s202_s23  ;;  %p208_p5 = scmp.lt.s32.totalorder %s202_s23, %s202_s23 }
   0xd   :  { %p209_p6 = por %p208_p5, %p207_p4 }
   0xf   :  { %p210_p7 = pnand %p209_p6, %p203_p3 }
  0x11   :  { %213 = shalt.err (!%p210_p7)
}
  0x12   :  { %20 = dma.hbm_to_vmem [thread:$0]  %s338_s0, 32, %s18_s13, [#allocation4]  }
  0x13   :  { %s214_s28 = scalar_lea.hbm %s340_s2, 256 }
  0x14   :  { %p215_p8 = scmp.ne.s32.totalorder %s340_s2, %s214_s28  ;;  %p218_p9 = scmp.lt.u32.totalorder %s214_s28, %s340_s2 }
  0x16   :  { %p220_p10 = pnand %p218_p9, %p215_p8 }
  0x18   :  { %223 = shalt.err (!%p220_p10)
}
  0x19   :  { %s224_s6 = scalar_lea.vmem %s290_s15, 256  ;;  %p229_p12 = scmp.lt.s32.totalorder %s290_s15, %s290_s15 }
  0x1a   :  { %p225_p11 = scmp.ne.s32.totalorder %s290_s15, %s224_s6  ;;  %p230_p13 = scmp.lt.s32.totalorder %s224_s6, %s224_s6 }
  0x1c   :  { %p231_p0 = por %p230_p13, %p229_p12 }
  0x1e   :  { %p232_p1 = pnand %p231_p0, %p225_p11 }
  0x20   :  { %235 = shalt.err (!%p232_p1)
}
  0x21   :  { %s266_s0 = smov 128   ;;  %s267_s7 = smov 8  }
  0x22   :  { %34 = dma.hbm_to_vmem [thread:$0]  %s340_s2, 256, %s290_s15, [#allocation7], %s266_s0, %s266_s0, %s267_s7  }
  0x23   :  { %258 = dma.done.wait [#allocation4], 32  }
  0x24   :  { %259 = vsyncadd [#allocation4], 4294967264 }
  0x25   :  { %260 = dma.done.wait [#allocation7], 256  }
  0x26   :  { %261 = vsyncadd [#allocation7], 4294967040  ;;  %v58_v0 = vld [vmem:[#allocation3] sm:$0x3]  ;;  %v47_v1 = vld [vmem:[#allocation6] sm:$0xff]  ;;  %v74_v22 = vlaneseq  ;;  %vm112_vm0 = vcmask 1041409  }
  0x27   :  { %v82_v2 = vand.u32 2147483647, %v58_v0  ;;  %v48_v3 = vld [vmem:[#allocation6 + $0x8] sm:$0xff]  ;;  %v62_v4 = vrot.slane %v47_v1, 4  ;;  %v59_v25 = vld [vmem:[%s339_s1] sm:$0x3] }
  0x28   :  { %v68_v5 = vrot.slane %v48_v3, 4  ;;  %v75_v29 = vand.u32 127, %v74_v22  ;;  %v79_v30 = vmax.f32 %v58_v0, 0.0  ;;  %v80_v34 = vmul.f32 %v59_v25, %v58_v0  ;;  %s269_s14 = smov [#allocation8]  }
  0x29   :  { %v83_v6 = vsub.f32 0.0, %v82_v2  ;;  %v63_v7 = vmax.f32 %v47_v1, %v62_v4  ;;  %v116_v41 = vsub.f32 1.0, %v59_v25  ;;  %v268_v51 = vmov 0.0   ;;  %s159_s15 = sshll.u32 %s269_s14, 4  ;;  %s160_s15 = int_to_ptr.vmem [resolvable:$true] %s159_s15 }
  0x2a   :  { %v69_v8 = vmax.f32 %v48_v3, %v68_v5  ;;  %vm76_vm1 = vcmp.lt.s32.totalorder %v75_v29, 32  ;;  %v81_v46 = vsub.f32 %v79_v30, %v80_v34  ;;  %vm125_vm3 = vcmask 1041408   ;;  %s236_s17 = scalar_lea.vmem %s160_s15, 16  ;;  %s240_s18 = scalar_lea.vmem %s160_s15, 32 }
  0x2b   :  { %v84_v9 = vmul.f32 1.442695, %v83_v6  ;;  %v64_v10 = vrot.slane %v63_v7, 2  ;;  %v169_v52 = vsel %vm76_vm1, 1.0, %v268_v51  ;;  %p237_p2 = scmp.ne.s32.totalorder %s160_s15, %s236_s17  ;;  %p241_p3 = scmp.lt.s32.totalorder %s160_s15, %s160_s15 }
  0x2c   :  { %v70_v11 = vrot.slane %v69_v8, 2  ;;  %p242_p4 = scmp.lt.s32.totalorder %s240_s18, %s236_s17 }
  0x2d   :  { %180 = vpow2.f32 %v84_v9  ;;  %v65_v12 = vmax.f32 %v63_v7, %v64_v10 }
  0x2e   :  { %v71_v13 = vmax.f32 %v69_v8, %v70_v11  ;;  %p243_p5 = por %p242_p4, %p241_p3 }
  0x2f   :  { %v66_v14 = vrot.slane %v65_v12, 1 }
  0x30   :  { %v72_v15 = vrot.slane %v71_v13, 1  ;;  %p244_p6 = pnand %p243_p5, %p237_p2 }
  0x31   :  { %v67_v16 = vmax.f32 %v65_v12, %v66_v14 }
  0x32   :  { %v73_v17 = vmax.f32 %v71_v13, %v72_v15 }
  0x33   :  { %182 = vlog2.f32 %v67_v16  ;;  %v102_v18 = vsub.f32 1.0, %v67_v16 }
  0x34   :  { %184 = vlog2.f32 %v73_v17  ;;  %v103_v19 = vsub.f32 1.0, %v73_v17 }
  0x35   :  { %186 = vlog2.f32 %v102_v18 }
  0x36   :  { %188 = vlog2.f32 %v103_v19 }
  0x37   :  { %v181_v20 = vpop.eup %180 }
  0x38   :  { %v86_v21 = vadd.f32 1.0, %v181_v20  ;;  %v89_v23 = vmul.f32 -0.5, %v181_v20  ;;  %v92_v35 = vand.u32 2147483647, %v181_v20 }
  0x3a   :  { %190 = vlog2.f32 %v86_v21  ;;  %v90_v31 = vadd.f32 1.0, %v89_v23  ;;  %vm93_vm2 = vcmp.lt.f32.partialorder %v92_v35, 0.0004427343 }
  0x3c   :  { %v91_v42 = vmul.f32 %v181_v20, %v90_v31 }
  0x3d   :  { %v183_v24 = vpop.eup %182 }
  0x3e   :  { %v185_v26 = vpop.eup %184  ;;  %v97_v27 = vmul.f32 0.6931472, %v183_v24 }
  0x3f   :  { %v187_v28 = vpop.eup %186  ;;  %v99_v32 = vmul.f32 0.6931472, %v185_v26 }
  0x40   :  { %v189_v33 = vpop.eup %188  ;;  %v100_v36 = vmax.f32 %v97_v27, -100.0  ;;  %v105_v37 = vmul.f32 0.6931472, %v187_v28 }
  0x41   :  { %v101_v38 = vmax.f32 %v99_v32, -100.0  ;;  %v107_v39 = vmul.f32 0.6931472, %v189_v33 }
  0x42   :  { %v108_v40 = vmax.f32 %v105_v37, -100.0 }
  0x43   :  { %v109_v43 = vmax.f32 %v107_v39, -100.0  ;;  %v113_v44 = vsel %vm112_vm0, %v101_v38, %v100_v36 }
  0x44   :  { %v191_v45 = vpop.eup %190  ;;  %v115_v47 = vmul.f32 %v113_v44, %v59_v25 }
  0x45   :  { %v88_v48 = vmul.f32 0.6931472, %v191_v45  ;;  %v119_v49 = vsel %vm112_vm0, %v109_v43, %v108_v40 }
  0x46   :  { %v121_v50 = vmul.f32 %v119_v49, %v116_v41 }
  0x47   :  { %v94_v53 = vsel %vm93_vm2, %v91_v42, %v88_v48 }
  0x48   :  { %v95_v54 = vadd.f32 %v94_v53, %v81_v46  ;;  %v122_v55 = vadd.f32 %v121_v50, %v115_v47 }
  0x4a   :  { %v124_v56 = vmul.f32 %v169_v52, %v95_v54  ;;  %v123_v57 = vsub.f32 0.0, %v122_v55 }
  0x4c   :  { %v126_v58 = vsel %vm125_vm3, %v124_v56, 0.0  ;;  %v136_v59 = vmul.f32 %v169_v52, %v123_v57 }
  0x4d   :  { %127 = vadd.xlane.f32.xlu0 %v126_v58 }
  0x4e   :  { %v137_v60 = vsel %vm125_vm3, %v136_v59, 0.0 }
  0x51   :  { %138 = vadd.xlane.f32.xlu0 %v137_v60 }
  0xda   :  { %v128_v61 = vpop.xlane.xlu0 %127 }
  0xdb   :  { %v129_v62 = vrot.slane %v128_v61, 4 }
  0xdd   :  { %v130_v63 = vadd.f32 %v129_v62, %v128_v61 }
  0xde   :  { %v139_v0 = vpop.xlane.xlu0 %138 }
  0xdf   :  { %v131_v1 = vrot.slane %v130_v63, 2  ;;  %v140_v2 = vrot.slane %v139_v0, 4 }
  0xe1   :  { %v141_v3 = vadd.f32 %v140_v2, %v139_v0  ;;  %v132_v4 = vadd.f32 %v131_v1, %v130_v63 }
  0xe3   :  { %v142_v5 = vrot.slane %v141_v3, 2  ;;  %v133_v6 = vrot.slane %v132_v4, 1 }
  0xe5   :  { %v143_v7 = vadd.f32 %v142_v5, %v141_v3  ;;  %v134_v8 = vadd.f32 %v133_v6, %v132_v4 }
  0xe7   :  { %170 = vpush %v134_v8  ;;  %v144_v9 = vrot.slane %v143_v7, 1 }
  0xe9   :  { %v145_v10 = vadd.f32 %v144_v9, %v143_v7 }
  0xeb   :  { %172 = vpush %v145_v10 }
 0x118   :  { %s171_s1 = spop %170 }
 0x11c   :  { %s173_s11 = spop %172 }
 0x11d   :  { %s147_s12 = smul.f32 0.5, %s173_s11 }
 0x11f   :  { %s148_s13 = sadd.f32 %s171_s1, %s147_s12 }
 0x121   :  { %s149_s16 = smul.f32 0.015625, %s148_s13 }
 0x123   :  { %v150_v11 = vstv %s149_s16 }
 0x124   :  { %152 = vst [vmem:[#allocation8] sm:$0x1] %v150_v11 }
 0x125   :  { %247 = shalt.err (!%p244_p6)
}
 0x126   :  { %s248_s21 = scalar_lea.hbm %s341_s3, 16 }
 0x127   :  { %p249_p7 = scmp.ne.s32.totalorder %s341_s3, %s248_s21  ;;  %p252_p8 = scmp.lt.u32.totalorder %s248_s21, %s341_s3 }
 0x129   :  { %p254_p9 = pnand %p252_p8, %p249_p7 }
 0x12b   :  { %257 = shalt.err (!%p254_p9)
}
 0x12c   :  { %162 = dma.vmem_to_hbm [thread:$0]  %s160_s15, 16, %s341_s3, [#allocation5]  }
 0x12d   :  { %262 = dma.done.wait [#allocation5], 16  }
 0x12e   :  { %263 = vsyncadd [#allocation5], 4294967280 }
 0x12f   :  { %166 = vsyncpa [#allocation4], 1 }
 0x130   :  { %167 = vsyncpa [#allocation7], 1 }
 0x131   :  { %168 = vsyncpa [#allocation5], 1 }

</bundles_post_ra>
